<compile_context>
chip_gen: v5e
topology: v5e:2x2
jax: 0.10.0
libtpu: 0.0.40
codegen_flags: <defaults>
</compile_context>

<pallas_src>
import jax
import jax.numpy as jnp
from jax import lax
from jax.experimental import pallas as pl
from jax.experimental.pallas import tpu as pltpu  # noqa: F401  (TPU backend import)


def rnn_kernel(x_ref, w_ih_t_ref, w_hh_t_ref, bias_ref, o_ref):
    """Whole RNN forward in one invocation.

    x_ref:      (B, S, E)  input in its original (batch, seq, emb) layout
    w_ih_t_ref: (E, E)     W_ih^T (pre-transposed in the wrapper)
    w_hh_t_ref: (E, E)     W_hh^T (pre-transposed in the wrapper)
    bias_ref:   (1, E)     b_ih + b_hh (folded in the wrapper)
    o_ref:      (B, E)     last-timestep hidden state
    """
    B, S, E = x_ref.shape

    x = x_ref[...]                       # (B, S, E) f32
    w_ih_t = w_ih_t_ref[...]             # (E, E)
    w_hh_t = w_hh_t_ref[...]             # (E, E)
    bias = bias_ref[...]                 # (1, E)

    # Non-recurrent phase: one MXU matmul for all timesteps.
    # xp[b, t] = x[b, t] @ W_ih^T + (b_ih + b_hh)
    xp = jnp.dot(
        x.reshape(B * S, E), w_ih_t, preferred_element_type=jnp.float32
    ).reshape(B, S, E) + bias.reshape(1, 1, E)

    # Serial recurrence, fully unrolled (S is small & static); h stays in vregs.
    h = jnp.zeros((B, E), jnp.float32)
    for t in range(S):
        h = jnp.tanh(
            xp[:, t, :]
            + jnp.dot(h, w_hh_t, preferred_element_type=jnp.float32)
        )

    o_ref[...] = h.astype(o_ref.dtype)


def requirement_net4_forward(dlg, w_ih, w_hh, b_ih, b_hh):
    """dlg: (B, S, E) float32.  Returns (B, E) — last-timestep RNN hidden state."""
    B, S, E = dlg.shape
    w_ih_t = jnp.transpose(w_ih)            # (E, E): so h = x @ W_ih^T is x @ w_ih_t
    w_hh_t = jnp.transpose(w_hh)
    bias = (b_ih + b_hh).reshape(1, E)      # fold both biases

    return pl.pallas_call(
        rnn_kernel,
        out_shape=jax.ShapeDtypeStruct((B, E), dlg.dtype),
        in_specs=[
            pl.BlockSpec((B, S, E), lambda: (0, 0, 0)),   # whole input in VMEM
            pl.BlockSpec((E, E), lambda: (0, 0)),         # W_ih^T
            pl.BlockSpec((E, E), lambda: (0, 0)),         # W_hh^T
            pl.BlockSpec((1, E), lambda: (0, 0)),         # folded bias
        ],
        out_specs=pl.BlockSpec((B, E), lambda: (0, 0)),
    )(dlg, w_ih_t, w_hh_t, bias)


def reference_forward(dlg, w_ih, w_hh, b_ih, b_hh):
    """Pure-JAX reference matching torch.nn.RNN semantics."""
    B, S, E = dlg.shape
    x = jnp.transpose(dlg, (1, 0, 2))  # (S, B, E)

    def step(h, x_t):
        h_new = jnp.tanh(x_t @ w_ih.T + b_ih + h @ w_hh.T + b_hh)
        return h_new, None

    h0 = jnp.zeros((B, E), jnp.float32)
    h_last, _ = lax.scan(step, h0, x)
    return h_last


if __name__ == "__main__":
    # Small shapes consistent with the module: batch=2, seq=8, emb=32.
    B, S, E = 2, 8, 32

    key = jax.random.PRNGKey(0)
    k_x, k_wih, k_whh, k_bih, k_bhh = jax.random.split(key, 5)

    # Deterministic parameter init (PyTorch-style uniform(-1/sqrt(E), 1/sqrt(E))).
    bound = 1.0 / jnp.sqrt(jnp.float32(E))
    w_ih = jax.random.uniform(k_wih, (E, E), jnp.float32, -bound, bound)
    w_hh = jax.random.uniform(k_whh, (E, E), jnp.float32, -bound, bound)
    b_ih = jax.random.uniform(k_bih, (E,), jnp.float32, -bound, bound)
    b_hh = jax.random.uniform(k_bhh, (E,), jnp.float32, -bound, bound)

    dlg = jax.random.normal(k_x, (B, S, E), jnp.float32)

    out = requirement_net4_forward(dlg, w_ih, w_hh, b_ih, b_hh)
    out = jax.block_until_ready(out)

    ref = reference_forward(dlg, w_ih, w_hh, b_ih, b_hh)
    assert out.shape == (B, E)
    assert jnp.allclose(out, ref, atol=1e-5, rtol=1e-5), "Pallas RNN mismatch vs reference"

    print("KERNEL_OK")
</pallas_src>

<mosaic_0001>
module attributes {stable_mosaic.version = 11 : i64} {
  func.func @rnn_kernel(%arg0: memref<2x8x32xf32, #tpu.memory_space<vmem>>, %arg1: memref<32x32xf32, #tpu.memory_space<vmem>>, %arg2: memref<32x32xf32, #tpu.memory_space<vmem>>, %arg3: memref<1x32xf32, #tpu.memory_space<vmem>>, %arg4: memref<2x32xf32, #tpu.memory_space<vmem>>) attributes {dimension_semantics = [], scalar_prefetch = 0 : i64, scratch_operands = 0 : i64, tpu.core_type = #tpu.core_type<tc>} {
    %c0 = arith.constant 0 : index
    %c0_0 = arith.constant 0 : index
    %c0_1 = arith.constant 0 : index
    %0 = vector.load %arg0[%c0, %c0_0, %c0_1] : memref<2x8x32xf32, #tpu.memory_space<vmem>>, vector<2x8x32xf32>
    %c0_2 = arith.constant 0 : index
    %c0_3 = arith.constant 0 : index
    %1 = vector.load %arg1[%c0_2, %c0_3] : memref<32x32xf32, #tpu.memory_space<vmem>>, vector<32x32xf32>
    %c0_4 = arith.constant 0 : index
    %c0_5 = arith.constant 0 : index
    %2 = vector.load %arg2[%c0_4, %c0_5] : memref<32x32xf32, #tpu.memory_space<vmem>>, vector<32x32xf32>
    %c0_6 = arith.constant 0 : index
    %c0_7 = arith.constant 0 : index
    %3 = vector.load %arg3[%c0_6, %c0_7] : memref<1x32xf32, #tpu.memory_space<vmem>>, vector<1x32xf32>
    %4 = vector.shape_cast %0 : vector<2x8x32xf32> to vector<16x32xf32>
    %cst = arith.constant dense<0.000000e+00> : vector<16x32xf32>
    %5 = tpu.matmul %4, %1, %cst {dimension_numbers = #tpu.dot_dimension_numbers<[1], [0], [0], [1], [0, 0, 1, 1], [], []>} : vector<16x32xf32>, vector<32x32xf32>, vector<16x32xf32> -> vector<16x32xf32>
    %6 = vector.shape_cast %5 : vector<16x32xf32> to vector<2x8x32xf32>
    %7 = vector.shape_cast %3 : vector<1x32xf32> to vector<1x1x32xf32>
    %8 = vector.broadcast %7 : vector<1x1x32xf32> to vector<2x8x32xf32>
    %9 = arith.addf %6, %8 : vector<2x8x32xf32>
    %cst_8 = arith.constant 0.000000e+00 : f32
    %10 = vector.broadcast %cst_8 : f32 to vector<2x32xf32>
    %11 = vector.extract_strided_slice %9 {offsets = [0, 0, 0], sizes = [2, 1, 32], strides = [1, 1, 1]} : vector<2x8x32xf32> to vector<2x1x32xf32>
    %12 = vector.shape_cast %11 : vector<2x1x32xf32> to vector<2x32xf32>
    %cst_9 = arith.constant dense<0.000000e+00> : vector<2x32xf32>
    %13 = tpu.matmul %10, %2, %cst_9 {dimension_numbers = #tpu.dot_dimension_numbers<[1], [0], [0], [1], [0, 0, 1, 1], [], []>} : vector<2x32xf32>, vector<32x32xf32>, vector<2x32xf32> -> vector<2x32xf32>
    %14 = arith.addf %12, %13 : vector<2x32xf32>
    %15 = math.tanh %14 : vector<2x32xf32>
    %16 = vector.extract_strided_slice %9 {offsets = [0, 1, 0], sizes = [2, 1, 32], strides = [1, 1, 1]} : vector<2x8x32xf32> to vector<2x1x32xf32>
    %17 = vector.shape_cast %16 : vector<2x1x32xf32> to vector<2x32xf32>
    %cst_10 = arith.constant dense<0.000000e+00> : vector<2x32xf32>
    %18 = tpu.matmul %15, %2, %cst_10 {dimension_numbers = #tpu.dot_dimension_numbers<[1], [0], [0], [1], [0, 0, 1, 1], [], []>} : vector<2x32xf32>, vector<32x32xf32>, vector<2x32xf32> -> vector<2x32xf32>
    %19 = arith.addf %17, %18 : vector<2x32xf32>
    %20 = math.tanh %19 : vector<2x32xf32>
    %21 = vector.extract_strided_slice %9 {offsets = [0, 2, 0], sizes = [2, 1, 32], strides = [1, 1, 1]} : vector<2x8x32xf32> to vector<2x1x32xf32>
    %22 = vector.shape_cast %21 : vector<2x1x32xf32> to vector<2x32xf32>
    %cst_11 = arith.constant dense<0.000000e+00> : vector<2x32xf32>
    %23 = tpu.matmul %20, %2, %cst_11 {dimension_numbers = #tpu.dot_dimension_numbers<[1], [0], [0], [1], [0, 0, 1, 1], [], []>} : vector<2x32xf32>, vector<32x32xf32>, vector<2x32xf32> -> vector<2x32xf32>
    %24 = arith.addf %22, %23 : vector<2x32xf32>
    %25 = math.tanh %24 : vector<2x32xf32>
    %26 = vector.extract_strided_slice %9 {offsets = [0, 3, 0], sizes = [2, 1, 32], strides = [1, 1, 1]} : vector<2x8x32xf32> to vector<2x1x32xf32>
    %27 = vector.shape_cast %26 : vector<2x1x32xf32> to vector<2x32xf32>
    %cst_12 = arith.constant dense<0.000000e+00> : vector<2x32xf32>
    %28 = tpu.matmul %25, %2, %cst_12 {dimension_numbers = #tpu.dot_dimension_numbers<[1], [0], [0], [1], [0, 0, 1, 1], [], []>} : vector<2x32xf32>, vector<32x32xf32>, vector<2x32xf32> -> vector<2x32xf32>
    %29 = arith.addf %27, %28 : vector<2x32xf32>
    %30 = math.tanh %29 : vector<2x32xf32>
    %31 = vector.extract_strided_slice %9 {offsets = [0, 4, 0], sizes = [2, 1, 32], strides = [1, 1, 1]} : vector<2x8x32xf32> to vector<2x1x32xf32>
    %32 = vector.shape_cast %31 : vector<2x1x32xf32> to vector<2x32xf32>
    %cst_13 = arith.constant dense<0.000000e+00> : vector<2x32xf32>
    %33 = tpu.matmul %30, %2, %cst_13 {dimension_numbers = #tpu.dot_dimension_numbers<[1], [0], [0], [1], [0, 0, 1, 1], [], []>} : vector<2x32xf32>, vector<32x32xf32>, vector<2x32xf32> -> vector<2x32xf32>
    %34 = arith.addf %32, %33 : vector<2x32xf32>
    %35 = math.tanh %34 : vector<2x32xf32>
    %36 = vector.extract_strided_slice %9 {offsets = [0, 5, 0], sizes = [2, 1, 32], strides = [1, 1, 1]} : vector<2x8x32xf32> to vector<2x1x32xf32>
    %37 = vector.shape_cast %36 : vector<2x1x32xf32> to vector<2x32xf32>
    %cst_14 = arith.constant dense<0.000000e+00> : vector<2x32xf32>
    %38 = tpu.matmul %35, %2, %cst_14 {dimension_numbers = #tpu.dot_dimension_numbers<[1], [0], [0], [1], [0, 0, 1, 1], [], []>} : vector<2x32xf32>, vector<32x32xf32>, vector<2x32xf32> -> vector<2x32xf32>
    %39 = arith.addf %37, %38 : vector<2x32xf32>
    %40 = math.tanh %39 : vector<2x32xf32>
    %41 = vector.extract_strided_slice %9 {offsets = [0, 6, 0], sizes = [2, 1, 32], strides = [1, 1, 1]} : vector<2x8x32xf32> to vector<2x1x32xf32>
    %42 = vector.shape_cast %41 : vector<2x1x32xf32> to vector<2x32xf32>
    %cst_15 = arith.constant dense<0.000000e+00> : vector<2x32xf32>
    %43 = tpu.matmul %40, %2, %cst_15 {dimension_numbers = #tpu.dot_dimension_numbers<[1], [0], [0], [1], [0, 0, 1, 1], [], []>} : vector<2x32xf32>, vector<32x32xf32>, vector<2x32xf32> -> vector<2x32xf32>
    %44 = arith.addf %42, %43 : vector<2x32xf32>
    %45 = math.tanh %44 : vector<2x32xf32>
    %46 = vector.extract_strided_slice %9 {offsets = [0, 7, 0], sizes = [2, 1, 32], strides = [1, 1, 1]} : vector<2x8x32xf32> to vector<2x1x32xf32>
    %47 = vector.shape_cast %46 : vector<2x1x32xf32> to vector<2x32xf32>
    %cst_16 = arith.constant dense<0.000000e+00> : vector<2x32xf32>
    %48 = tpu.matmul %45, %2, %cst_16 {dimension_numbers = #tpu.dot_dimension_numbers<[1], [0], [0], [1], [0, 0, 1, 1], [], []>} : vector<2x32xf32>, vector<32x32xf32>, vector<2x32xf32> -> vector<2x32xf32>
    %49 = arith.addf %47, %48 : vector<2x32xf32>
    %50 = math.tanh %49 : vector<2x32xf32>
    %c0_17 = arith.constant 0 : index
    %c0_18 = arith.constant 0 : index
    %51 = vector.load %arg4[%c0_17, %c0_18] : memref<2x32xf32, #tpu.memory_space<vmem>>, vector<2x32xf32>
    tpu.vector_store %arg4[%c0_17, %c0_18], %50 {strides = array<i32>} : memref<2x32xf32, #tpu.memory_space<vmem>>, vector<2x32xf32>,
    return
  }
}

</mosaic_0001>

<bundles_post_ra>
// kernel: tpu_custom_call.1
= control target key start
LH: loop header
LB: loop body
LE: loop exit
PB: predicated region body
PF: predicated region fallthrough
CT: control target
= control target key end

     0   :  { %9 = vsyncpa [#allocation3], 0  ;;  %s653_s0 = inlined_call_operand.hbm [shape: f32[2,8,32], index: 0, kind: input, shape index: {}]   ;;  %s654_s1 = inlined_call_operand.hbm [shape: f32[32,32], index: 1, kind: input, shape index: {}]   ;;  %s655_s2 = inlined_call_operand.hbm [shape: f32[32,32], index: 2, kind: input, shape index: {}]   ;;  %s656_s3 = inlined_call_operand.vmem [shape: f32[1,32], index: 3, kind: input, shape index: {}]   ;;  %s657_s4 = inlined_call_operand.hbm [shape: f32[2,32], index: 4, kind: output, shape index: {}]  }
   0x1   :  { %10 = vsyncpa [#allocation6], 0 }
   0x2   :  { %11 = vsyncpa [#allocation4], 0  ;;  %s29_s17 = sshll.u32 %s654_s1, 4  ;;  %s570_s18 = smov [#allocation5]   ;;  %s30_s17 = int_to_ptr.hbm [resolvable:$true] %s29_s17 }
   0x3   :  { %s31_s19 = sshll.u32 %s570_s18, 4  ;;  %s16_s22 = sshll.u32 %s653_s0, 4  ;;  %s32_s19 = int_to_ptr.vmem [resolvable:$true] %s31_s19  ;;  %s17_s22 = int_to_ptr.hbm [resolvable:$true] %s16_s22 }
   0x4   :  { %s571_s23 = smov 128   ;;  %s572_s24 = smov 8  }
   0x5   :  { %37 = dma.hbm_to_vmem [thread:$0]  %s30_s17, 512, %s32_s19, [#allocation6], %s571_s23, %s571_s23, %s572_s24  }
   0x6   :  { %s573_s25 = smov [#allocation2]   ;;  %s42_s29 = sshll.u32 %s655_s2, 4  ;;  %s43_s29 = int_to_ptr.hbm [resolvable:$true] %s42_s29 }
   0x7   :  { %s18_s26 = sshll.u32 %s573_s25, 4  ;;  %s574_s1 = smov [#allocation7]   ;;  %s19_s26 = int_to_ptr.vmem [resolvable:$true] %s18_s26 }
   0x8   :  { %24 = dma.hbm_to_vmem [thread:$0]  %s17_s22, 256, %s19_s26, [#allocation3], %s571_s23, %s571_s23, %s572_s24  }
   0x9   :  { %s44_s30 = sshll.u32 %s574_s1, 4  ;;  %s45_s30 = int_to_ptr.vmem [resolvable:$true] %s44_s30 }
   0xa   :  { %50 = dma.hbm_to_vmem [thread:$0]  %s43_s29, 512, %s45_s30, [#allocation6], %s571_s23, %s571_s23, %s572_s24  }
   0xb   :  { %564 = dma.done.wait [#allocation3], 256  }
   0xc   :  { %565 = vsyncadd [#allocation3], 4294967040 }
   0xd   :  { %566 = dma.done.wait [#allocation6], 1024  }
   0xe   :  { %567 = vsyncadd [#allocation6], 4294966272  ;;  %v70_v0 = vld [vmem:[#allocation5 + $0x18] sm:$0xff]  ;;  %v69_v1 = vld [vmem:[#allocation5 + $0x10] sm:$0xff]  ;;  %vm76_vm0 = vcmask 261120   ;;  %v575_v9 = vmov 0.0  }
   0xf   :  { %v74_v2 = vld [vmem:[#allocation7 + $0x18] sm:$0xff]  ;;  %95 = vmatpush.msra.mxu0 %v70_v0  ;;  %v73_v3 = vld [vmem:[#allocation7 + $0x10] sm:$0xff]  ;;  %v68_v4 = vld [vmem:[#allocation5 + $0x8] sm:$0xff]  ;;  %vm145_vm1 = vcmask 1041409   ;;  %vm397_vm2 = vcmask 261127   ;;  %s408_s8 = sshll.u32 %s657_s4, 4  ;;  %s409_s8 = int_to_ptr.hbm [resolvable:$true] %s408_s8 }
  0x10   :  { %126 = vmatpush.msra.mxu1 %v74_v2  ;;  %v72_v5 = vld [vmem:[#allocation7 + $0x8] sm:$0xff]  ;;  %161 = vmatpush.msra.mxu2 %v74_v2  ;;  %v67_v6 = vld [vmem:[#allocation5] sm:$0xff]  ;;  %v65_v8 = vld [vmem:[#allocation2] sm:$0xff]  ;;  %vm399_vm3 = vcmask 253952  }
  0x11   :  { %195 = vmatpush.msra.mxu3 %v74_v2  ;;  %96 = vmatpush.msra.mxu0 %v69_v1  ;;  %v71_v7 = vld [vmem:[#allocation7] sm:$0xff]  ;;  %v66_v10 = vld [vmem:[#allocation2 + $0x8] sm:$0xff]  ;;  %v435_v12 = vld [vmem:[%s656_s3] ss:$0 sm:$0xff]  ;;  %s576_s3 = smov [#allocation8]  }
  0x12   :  { %127 = vmatpush.msra.mxu1 %v73_v3  ;;  %162 = vmatpush.msra.mxu2 %v73_v3  ;;  %s406_s5 = sshll.u32 %s576_s3, 4  ;;  %s407_s5 = int_to_ptr.vmem [resolvable:$true] %s406_s5 }
  0x13   :  { %196 = vmatpush.msra.mxu3 %v73_v3  ;;  %97 = vmatpush.msra.mxu0 %v68_v4 }
  0x14   :  { %128 = vmatpush.msra.mxu1 %v72_v5  ;;  %163 = vmatpush.msra.mxu2 %v72_v5 }
  0x15   :  { %197 = vmatpush.msra.mxu3 %v72_v5  ;;  %98 = vmatpush.msra.mxu0 %v67_v6 }
  0x16   :  { %129 = vmatpush.msra.mxu1 %v71_v7  ;;  %419 = vmatmul.msk.f32.vlgmr.msra.gmra.mxu0 %vm76_vm0, %v65_v8 }
  0x17   :  { %130 = vmatmul.f32.vlgmr.msra.gmra.mxu1 %v575_v9  ;;  %164 = vmatpush.msra.mxu2 %v71_v7 }
  0x18   :  { %198 = vmatpush.msra.mxu3 %v71_v7  ;;  %231 = vmatpush.msrb.mxu1 %v74_v2 }
  0x19   :  { %267 = vmatpush.msrb.mxu2 %v74_v2  ;;  %339 = vmatpush.msrb.mxu0 %v74_v2 }
  0x1a   :  { %303 = vmatpush.msrb.mxu3 %v74_v2  ;;  %232 = vmatpush.msrb.mxu1 %v73_v3 }
  0x1b   :  { %268 = vmatpush.msrb.mxu2 %v73_v3  ;;  %340 = vmatpush.msrb.mxu0 %v73_v3 }
  0x1c   :  { %304 = vmatpush.msrb.mxu3 %v73_v3  ;;  %233 = vmatpush.msrb.mxu1 %v72_v5 }
  0x1d   :  { %269 = vmatpush.msrb.mxu2 %v72_v5  ;;  %341 = vmatpush.msrb.mxu0 %v72_v5 }
  0x1e   :  { %305 = vmatpush.msrb.mxu3 %v72_v5  ;;  %420 = vmatmul.msk.f32.gmra.mxu0 %vm76_vm0, %v66_v10 }
  0x1f   :  { %234 = vmatpush.msrb.mxu1 %v71_v7  ;;  %270 = vmatpush.msrb.mxu2 %v71_v7 }
  0x20   :  { %306 = vmatpush.msrb.mxu3 %v71_v7  ;;  %342 = vmatpush.msrb.mxu0 %v71_v7 }
  0x21   :  { %375 = vmatpush.msra.mxu1 %v74_v2 }
  0x23   :  { %376 = vmatpush.msra.mxu1 %v73_v3 }
  0x25   :  { %377 = vmatpush.msra.mxu1 %v72_v5 }
  0x27   :  { %378 = vmatpush.msra.mxu1 %v71_v7 }
  0x93   :  { %v100_v11 = vpop.f32.mrf.mxu0 }
  0x94   :  { %v131_v13 = vpop.f32.mrf.mxu1  ;;  %v616_v14 = vadd.f32 %v435_v12, %v100_v11 }
  0x95   :  { %v135_v15 = vrot.slane %v131_v13, 1 }
  0x96   :  { %v138_v18 = vadd.f32 %v131_v13, %v616_v14 }
  0x9b   :  { %v103_v16 = vpop.f32.mrf.mxu0 }
  0x9c   :  { %v618_v17 = vadd.f32 %v435_v12, %v103_v16 }
  0x9e   :  { %v139_v19 = vadd.f32 %v135_v15, %v618_v17 }
  0xa0   :  { %436 = vtanh.f32 %v139_v19 }
  0xa1   :  { %438 = vtanh.f32 %v138_v18 }
  0xa6   :  { %v437_v20 = vpop.eup %436 }
  0xa7   :  { %v144_v21 = vrot.slane %v437_v20, 7  ;;  %v439_v22 = vpop.eup %438 }
  0xa9   :  { %v146_v23 = vsel %vm145_vm1, %v144_v21, %v439_v22 }
  0xaa   :  { %421 = vmatmul.msk.f32.vlgmr.msra.gmra.mxu2 %vm76_vm0, %v146_v23 }
 0x12d   :  { %v166_v24 = vpop.f32.mrf.mxu2 }
 0x12e   :  { %v170_v25 = vrot.slane %v166_v24, 7  ;;  %v174_v27 = vadd.f32 %v166_v24, %v618_v17 }
 0x130   :  { %v173_v26 = vadd.f32 %v170_v25, %v616_v14 }
 0x132   :  { %440 = vtanh.f32 %v173_v26 }
 0x133   :  { %442 = vtanh.f32 %v174_v27 }
 0x138   :  { %v441_v28 = vpop.eup %440 }
 0x139   :  { %v179_v29 = vrot.slane %v441_v28, 1  ;;  %v443_v30 = vpop.eup %442 }
 0x13b   :  { %v180_v31 = vsel %vm145_vm1, %v443_v30, %v179_v29 }
 0x13c   :  { %422 = vmatmul.msk.f32.vlgmr.msra.gmra.mxu3 %vm76_vm0, %v180_v31 }
 0x1bf   :  { %v200_v32 = vpop.f32.mrf.mxu3 }
 0x1c0   :  { %v204_v33 = vrot.slane %v200_v32, 6  ;;  %v205_v34 = vrot.slane %v200_v32, 7 }
 0x1c2   :  { %v208_v35 = vadd.f32 %v204_v33, %v616_v14  ;;  %v209_v36 = vadd.f32 %v205_v34, %v618_v17 }
 0x1c4   :  { %444 = vtanh.f32 %v208_v35 }
 0x1c5   :  { %446 = vtanh.f32 %v209_v36 }
 0x1ca   :  { %v445_v37 = vpop.eup %444 }
 0x1cb   :  { %v447_v38 = vpop.eup %446  ;;  %v214_v39 = vrot.slane %v445_v37, 2 }
 0x1cc   :  { %v215_v40 = vrot.slane %v447_v38, 1 }
 0x1ce   :  { %v216_v41 = vsel %vm145_vm1, %v215_v40, %v214_v39 }
 0x1cf   :  { %423 = vmatmul.msk.f32.vlgmr.msrb.gmra.mxu1 %vm76_vm0, %v216_v41 }
 0x24c   :  { %v236_v42 = vpop.f32.mrf.mxu1 }
 0x24d   :  { %v240_v43 = vrot.slane %v236_v42, 5  ;;  %v241_v44 = vrot.slane %v236_v42, 6 }
 0x24f   :  { %v244_v45 = vadd.f32 %v240_v43, %v616_v14  ;;  %v245_v46 = vadd.f32 %v241_v44, %v618_v17 }
 0x251   :  { %448 = vtanh.f32 %v244_v45 }
 0x252   :  { %450 = vtanh.f32 %v245_v46 }
 0x257   :  { %v449_v47 = vpop.eup %448 }
 0x258   :  { %v451_v48 = vpop.eup %450  ;;  %v250_v49 = vrot.slane %v449_v47, 3 }
 0x259   :  { %v251_v50 = vrot.slane %v451_v48, 2 }
 0x25b   :  { %v252_v51 = vsel %vm145_vm1, %v251_v50, %v250_v49 }
 0x25c   :  { %424 = vmatmul.msk.f32.vlgmr.msrb.gmra.mxu2 %vm76_vm0, %v252_v51 }
 0x2df   :  { %v272_v52 = vpop.f32.mrf.mxu2 }
 0x2e0   :  { %v276_v53 = vrot.slane %v272_v52, 4  ;;  %v277_v54 = vrot.slane %v272_v52, 5 }
 0x2e2   :  { %v280_v55 = vadd.f32 %v276_v53, %v616_v14  ;;  %v281_v56 = vadd.f32 %v277_v54, %v618_v17 }
 0x2e4   :  { %452 = vtanh.f32 %v280_v55 }
 0x2e5   :  { %454 = vtanh.f32 %v281_v56 }
 0x2ea   :  { %v453_v57 = vpop.eup %452 }
 0x2eb   :  { %v455_v58 = vpop.eup %454  ;;  %v286_v59 = vrot.slane %v453_v57, 4 }
 0x2ec   :  { %v287_v60 = vrot.slane %v455_v58, 3 }
 0x2ee   :  { %v288_v61 = vsel %vm145_vm1, %v287_v60, %v286_v59 }
 0x2ef   :  { %425 = vmatmul.msk.f32.vlgmr.msrb.gmra.mxu3 %vm76_vm0, %v288_v61 }
 0x372   :  { %v308_v62 = vpop.f32.mrf.mxu3 }
 0x373   :  { %v312_v63 = vrot.slane %v308_v62, 3  ;;  %v313_v0 = vrot.slane %v308_v62, 4 }
 0x375   :  { %v316_v1 = vadd.f32 %v312_v63, %v616_v14  ;;  %v317_v2 = vadd.f32 %v313_v0, %v618_v17 }
 0x377   :  { %456 = vtanh.f32 %v316_v1 }
 0x378   :  { %458 = vtanh.f32 %v317_v2 }
 0x37d   :  { %v457_v3 = vpop.eup %456 }
 0x37e   :  { %v459_v4 = vpop.eup %458  ;;  %v322_v5 = vrot.slane %v457_v3, 5 }
 0x37f   :  { %v323_v6 = vrot.slane %v459_v4, 4 }
 0x381   :  { %v324_v7 = vsel %vm145_vm1, %v323_v6, %v322_v5 }
 0x382   :  { %426 = vmatmul.msk.f32.vlgmr.msrb.gmra.mxu0 %vm76_vm0, %v324_v7 }
 0x3ff   :  { %v344_v8 = vpop.f32.mrf.mxu0 }
 0x400   :  { %v348_v9 = vrot.slane %v344_v8, 2  ;;  %v349_v10 = vrot.slane %v344_v8, 3 }
 0x402   :  { %v352_v11 = vadd.f32 %v348_v9, %v616_v14  ;;  %v353_v12 = vadd.f32 %v349_v10, %v618_v17 }
 0x404   :  { %460 = vtanh.f32 %v352_v11 }
 0x405   :  { %462 = vtanh.f32 %v353_v12 }
 0x40a   :  { %v461_v13 = vpop.eup %460 }
 0x40b   :  { %v463_v15 = vpop.eup %462  ;;  %v358_v16 = vrot.slane %v461_v13, 6 }
 0x40c   :  { %v359_v18 = vrot.slane %v463_v15, 5 }
 0x40e   :  { %v360_v19 = vsel %vm145_vm1, %v359_v18, %v358_v16 }
 0x40f   :  { %427 = vmatmul.msk.f32.vlgmr.msra.gmra.mxu1 %vm76_vm0, %v360_v19 }
 0x48c   :  { %v380_v20 = vpop.f32.mrf.mxu1 }
 0x48d   :  { %v384_v21 = vrot.slane %v380_v20, 1  ;;  %v385_v22 = vrot.slane %v380_v20, 2 }
 0x48f   :  { %v388_v23 = vadd.f32 %v384_v21, %v616_v14  ;;  %v389_v24 = vadd.f32 %v385_v22, %v618_v17 }
 0x491   :  { %464 = vtanh.f32 %v388_v23 }
 0x492   :  { %466 = vtanh.f32 %v389_v24 }
 0x497   :  { %v465_v25 = vpop.eup %464 }
 0x498   :  { %v467_v26 = vpop.eup %466  ;;  %398 = vst.msk [vmem:[#allocation8 - $0x7] sm:$0x80] %vm397_vm2, %v465_v25 }
 0x499   :  { %v394_v27 = vrot.slane %v467_v26, 7 }
 0x49b   :  { %400 = vst.msk [vmem:[#allocation8 + $0x1] sm:$0x1] %vm399_vm3, %v394_v27 }
 0x49c   :  { %411 = dma.vmem_to_hbm [thread:$0]  %s407_s5, 32, %s409_s8, [#allocation4]  }
 0x49d   :  { %568 = dma.done.wait [#allocation4], 32  }
 0x49e   :  { %569 = vsyncadd [#allocation4], 4294967264 }
 0x49f   :  { %416 = vsyncpa [#allocation3], 1 }
 0x4a0   :  { %417 = vsyncpa [#allocation6], 1 }
 0x4a1   :  { %418 = vsyncpa [#allocation4], 1 }

</bundles_post_ra>
